<compile_context>
chip_gen: v5e
topology: v5e:2x2
jax: 0.10.0
libtpu: 0.0.40
codegen_flags: <defaults>
</compile_context>

<pallas_src>
import jax
import jax.numpy as jnp
from jax.experimental import pallas as pl
from jax.experimental.pallas import tpu as pltpu


def _round_up(x, m):
    return (x + m - 1) // m * m


def _ginet_conv_kernel(rowidx_ref, xcol_ref, wfc_ref, out_ref, acc_ref):
    j = pl.program_id(1)

    @pl.when(j == 0)
    def _():
        acc_ref[...] = jnp.zeros_like(acc_ref)

    tile_n, _ = acc_ref.shape
    tile_e = xcol_ref.shape[0]

    # scatter_sum of this edge tile into the node accumulator, expressed as a
    # one-hot [TILE_N, TILE_E] matmul on the MXU (contraction over edges).
    # Padded edges have row index == N_pad (out of range for every node block)
    # -> their one-hot column is all zeros and they contribute nothing.
    node_base = pl.program_id(0) * tile_n
    local_row = rowidx_ref[...] - node_base                  # [1, TILE_E]
    local_ids = jax.lax.broadcasted_iota(jnp.int32, (tile_n, tile_e), 0)
    onehot = (local_ids == local_row).astype(jnp.float32)    # [TILE_N, TILE_E]
    acc_ref[...] += jnp.dot(onehot, xcol_ref[...],
                            preferred_element_type=jnp.float32)

    # Last edge tile for this node block: apply fc to the aggregated features
    # and emit one lane-dense [TILE_N, C_out_pad] store.
    @pl.when(j == pl.num_programs(1) - 1)
    def _():
        out_ref[...] = jnp.dot(acc_ref[...], wfc_ref[...],
                               preferred_element_type=jnp.float32)


def ginet_conv_layer(x, edge_index, edge_attr, w_fc_t, w_edge_t, w_att_t,
                     *, tile_e=1024, tile_n=256):
    """Pallas implementation of GINetConvLayer.forward.

    Args:
      x: [N, C_in] float32 node features.
      edge_index: [2, E] int (row, col).
      edge_attr: [E] or [E, F_e] edge features (accepted for interface
        fidelity; provably does not affect the output — see header comment).
      w_fc_t:   [C_in, C_out]       (torch fc.weight transposed)
      w_edge_t: [F_e, F_e]          (unused: dead branch, softmax(dim=1)==1)
      w_att_t:  [2*C_out + F_e, 1]  (unused: dead branch, softmax(dim=1)==1)
    Returns: [N, C_out] float32.
    """
    del edge_attr, w_edge_t, w_att_t  # attention branch is exactly identity

    x = x.astype(jnp.float32)
    row = edge_index[0].astype(jnp.int32)
    col = edge_index[1].astype(jnp.int32)

    n_nodes, c_in = x.shape
    n_edges = row.shape[0]
    c_out = w_fc_t.shape[1]

    # ---- padding so every BlockSpec is (8,128)-friendly and lane-dense -----
    n_pad8 = _round_up(n_nodes, 8)
    tile_n = min(tile_n, n_pad8)                    # node block (multiple of 8)
    n_pad = _round_up(n_pad8, tile_n)

    tile_e = min(tile_e, _round_up(n_edges, 128))   # edge tile (multiple of 128)
    e_pad = _round_up(n_edges, tile_e)

    c_out_pad = _round_up(c_out, 128)               # lane-dense output store

    # Only x[col] is gathered (the x[row] gather fed the dead attention path).
    x_col = jnp.zeros((e_pad, c_in), jnp.float32).at[:n_edges].set(x[col])
    # Padded edges scatter to out-of-range row id n_pad -> zero one-hot column.
    row2d = jnp.full((1, e_pad), n_pad, jnp.int32).at[0, :n_edges].set(row)
    w_fc_p = jnp.zeros((c_in, c_out_pad), jnp.float32).at[:, :c_out].set(
        w_fc_t.astype(jnp.float32))

    grid = (n_pad // tile_n, e_pad // tile_e)

    cost = pl.CostEstimate(
        flops=2 * n_pad * e_pad * c_in + 2 * n_pad * c_in * c_out_pad,
        transcendentals=0,
        bytes_accessed=4 * (grid[0] * e_pad * (c_in + 1) + c_in * c_out_pad
                            + n_pad * c_out_pad))

    out = pl.pallas_call(
        _ginet_conv_kernel,
        out_shape=jax.ShapeDtypeStruct((n_pad, c_out_pad), jnp.float32),
        grid_spec=pltpu.PrefetchScalarGridSpec(
            num_scalar_prefetch=0,
            grid=grid,
            in_specs=[
                pl.BlockSpec((1, tile_e), lambda i, j: (0, j)),        # row ids
                pl.BlockSpec((tile_e, c_in), lambda i, j: (j, 0)),     # x[col]
                pl.BlockSpec((c_in, c_out_pad), lambda i, j: (0, 0)),  # W_fc (resident)
            ],
            out_specs=pl.BlockSpec((tile_n, c_out_pad), lambda i, j: (i, 0)),
            scratch_shapes=[pltpu.VMEM((tile_n, c_in), jnp.float32)],
        ),
        compiler_params=pltpu.CompilerParams(
            dimension_semantics=("parallel", "arbitrary"),
            vmem_limit_bytes=32 * 1024 * 1024),
        cost_estimate=cost,
    )(row2d, x_col, w_fc_p)

    return out[:n_nodes, :c_out]


def _reference(x, edge_index, edge_attr, w_fc_t, w_edge_t, w_att_t):
    """Pure-JAX reference mirroring the torch forward semantics verbatim."""
    if edge_attr.ndim == 1:
        edge_attr = edge_attr[:, None]
    row, col = edge_index[0], edge_index[1]
    xcol = x[col] @ w_fc_t
    xrow = x[row] @ w_fc_t
    ed = edge_attr @ w_edge_t
    alpha = jnp.concatenate([xrow, xcol, ed], axis=1) @ w_att_t
    alpha = jnp.where(alpha > 0, alpha, 0.01 * alpha)
    alpha = jax.nn.softmax(alpha, axis=1)
    h = alpha * xcol
    out = jnp.zeros((x.shape[0], w_fc_t.shape[1]), jnp.float32)
    return out.at[row].add(h)


if __name__ == "__main__":
    key = jax.random.PRNGKey(0)
    n_nodes, c_in, c_out, f_e, n_edges = 16, 8, 32, 4, 32

    k1, k2, k3, k4, k5, k6 = jax.random.split(key, 6)
    x = jax.random.normal(k1, (n_nodes, c_in), jnp.float32)
    edge_index = jax.random.randint(k2, (2, n_edges), 0, n_nodes, jnp.int32)
    edge_attr = jax.random.normal(k3, (n_edges, f_e), jnp.float32)

    # reset_parameters(): uniform(size=in_channels) -> U(-1/sqrt(C_in), 1/sqrt(C_in))
    bound = 1.0 / (c_in ** 0.5)
    w_fc_t = jax.random.uniform(k4, (c_in, c_out), jnp.float32, -bound, bound)
    w_edge_t = jax.random.uniform(k5, (f_e, f_e), jnp.float32, -bound, bound)
    w_att_t = jax.random.uniform(k6, (2 * c_out + f_e, 1), jnp.float32,
                                 -bound, bound)

    z = jax.block_until_ready(
        ginet_conv_layer(x, edge_index, edge_attr, w_fc_t, w_edge_t, w_att_t))
    z_ref = _reference(x, edge_index, edge_attr, w_fc_t, w_edge_t, w_att_t)

    assert z.shape == (n_nodes, c_out)
    assert jnp.allclose(z, z_ref, atol=1e-4, rtol=1e-4), "mismatch vs reference"
    print("KERNEL_OK")
</pallas_src>

<mosaic_0001>
module attributes {stable_mosaic.version = 11 : i64} {
  func.func @_ginet_conv_kernel(%arg0: i32, %arg1: i32, %arg2: memref<1x128xi32, #tpu.memory_space<vmem>>, %arg3: memref<128x8xf32, #tpu.memory_space<vmem>>, %arg4: memref<8x128xf32, #tpu.memory_space<vmem>>, %arg5: memref<16x128xf32, #tpu.memory_space<vmem>>, %arg6: memref<16x8xf32, #tpu.memory_space<vmem>>) attributes {dimension_semantics = [#tpu.dimension_semantics<parallel>, #tpu.dimension_semantics<arbitrary>], iteration_bounds = array<i64: 1, 1>, scalar_prefetch = 0 : i64, scratch_operands = 1 : i64, tpu.core_type = #tpu.core_type<tc>, window_params = [{transform_indices = @transform_0, window_bounds = array<i64: 1, 128>}, {transform_indices = @transform_1, window_bounds = array<i64: 128, 8>}, {pipeline_mode = #tpu.pipeline_mode<synchronous>, transform_indices = @transform_2, window_bounds = array<i64: 8, 128>}, {transform_indices = @transform_3, window_bounds = array<i64: 16, 128>}]} {
    %c0_i32 = arith.constant 0 : i32
    %0 = arith.cmpi eq, %arg1, %c0_i32 : i32
    %1 = arith.extui %0 : i1 to i32
    %c0_i32_0 = arith.constant 0 : i32
    %2 = arith.cmpi ne, %1, %c0_i32_0 : i32
    scf.if %2 {
      %cst_10 = arith.constant 0.000000e+00 : f32
      %20 = vector.broadcast %cst_10 : f32 to vector<16x8xf32>
      %c0_11 = arith.constant 0 : index
      %c0_12 = arith.constant 0 : index
      %21 = vector.load %arg6[%c0_11, %c0_12] : memref<16x8xf32, #tpu.memory_space<vmem>>, vector<16x8xf32>
      tpu.vector_store %arg6[%c0_11, %c0_12], %20 {strides = array<i32>} : memref<16x8xf32, #tpu.memory_space<vmem>>, vector<16x8xf32>,
    } else {
    }
    %c16_i32 = arith.constant 16 : i32
    %3 = arith.muli %arg0, %c16_i32 : i32
    %c0 = arith.constant 0 : index
    %c0_1 = arith.constant 0 : index
    %4 = vector.load %arg2[%c0, %c0_1] : memref<1x128xi32, #tpu.memory_space<vmem>>, vector<1x128xi32>
    %5 = vector.broadcast %3 : i32 to vector<1x128xi32>
    %6 = arith.subi %4, %5 : vector<1x128xi32>
    %7 = tpu.iota {dimensions = array<i32: 0>} : vector<16x128xi32>
    %8 = vector.broadcast %6 : vector<1x128xi32> to vector<16x128xi32>
    %9 = arith.cmpi eq, %7, %8 : vector<16x128xi32>
    %10 = arith.extui %9 : vector<16x128xi1> to vector<16x128xi32>
    %11 = arith.sitofp %10 : vector<16x128xi32> to vector<16x128xf32>
    %c0_2 = arith.constant 0 : index
    %c0_3 = arith.constant 0 : index
    %12 = vector.load %arg6[%c0_2, %c0_3] : memref<16x8xf32, #tpu.memory_space<vmem>>, vector<16x8xf32>
    %c0_4 = arith.constant 0 : index
    %c0_5 = arith.constant 0 : index
    %13 = vector.load %arg3[%c0_4, %c0_5] : memref<128x8xf32, #tpu.memory_space<vmem>>, vector<128x8xf32>
    %cst = arith.constant dense<0.000000e+00> : vector<16x8xf32>
    %14 = tpu.matmul %11, %13, %cst {dimension_numbers = #tpu.dot_dimension_numbers<[1], [0], [0], [1], [0, 0, 1, 1], [], []>} : vector<16x128xf32>, vector<128x8xf32>, vector<16x8xf32> -> vector<16x8xf32>
    %15 = arith.addf %12, %14 : vector<16x8xf32>
    %c0_6 = arith.constant 0 : index
    %c0_7 = arith.constant 0 : index
    %16 = vector.load %arg6[%c0_6, %c0_7] : memref<16x8xf32, #tpu.memory_space<vmem>>, vector<16x8xf32>
    tpu.vector_store %arg6[%c0_6, %c0_7], %15 {strides = array<i32>} : memref<16x8xf32, #tpu.memory_space<vmem>>, vector<16x8xf32>,
    %c0_i32_8 = arith.constant 0 : i32
    %17 = arith.cmpi eq, %arg1, %c0_i32_8 : i32
    %18 = arith.extui %17 : i1 to i32
    %c0_i32_9 = arith.constant 0 : i32
    %19 = arith.cmpi ne, %18, %c0_i32_9 : i32
    scf.if %19 {
      %c0_10 = arith.constant 0 : index
      %c0_11 = arith.constant 0 : index
      %20 = vector.load %arg6[%c0_10, %c0_11] : memref<16x8xf32, #tpu.memory_space<vmem>>, vector<16x8xf32>
      %c0_12 = arith.constant 0 : index
      %c0_13 = arith.constant 0 : index
      %21 = vector.load %arg4[%c0_12, %c0_13] : memref<8x128xf32, #tpu.memory_space<vmem>>, vector<8x128xf32>
      %cst_14 = arith.constant dense<0.000000e+00> : vector<16x128xf32>
      %22 = tpu.matmul %20, %21, %cst_14 {dimension_numbers = #tpu.dot_dimension_numbers<[1], [0], [0], [1], [0, 0, 1, 1], [], []>} : vector<16x8xf32>, vector<8x128xf32>, vector<16x128xf32> -> vector<16x128xf32>
      %c0_15 = arith.constant 0 : index
      %c0_16 = arith.constant 0 : index
      %23 = vector.load %arg5[%c0_15, %c0_16] : memref<16x128xf32, #tpu.memory_space<vmem>>, vector<16x128xf32>
      tpu.vector_store %arg5[%c0_15, %c0_16], %22 {strides = array<i32>} : memref<16x128xf32, #tpu.memory_space<vmem>>, vector<16x128xf32>,
    } else {
    }
    return
  }
  func.func @transform_0(%arg0: i32, %arg1: i32) -> (i32, i32) {
    %c0_i32 = arith.constant 0 : i32
    %c0_i32_0 = arith.constant 0 : i32
    return %c0_i32, %arg1 : i32, i32
  }
  func.func @transform_1(%arg0: i32, %arg1: i32) -> (i32, i32) {
    %c0_i32 = arith.constant 0 : i32
    %c0_i32_0 = arith.constant 0 : i32
    return %arg1, %c0_i32 : i32, i32
  }
  func.func @transform_2(%arg0: i32, %arg1: i32) -> (i32, i32) {
    %c0_i32 = arith.constant 0 : i32
    %c0_i32_0 = arith.constant 0 : i32
    %c0_i32_1 = arith.constant 0 : i32
    return %c0_i32, %c0_i32_0 : i32, i32
  }
  func.func @transform_3(%arg0: i32, %arg1: i32) -> (i32, i32) {
    %c0_i32 = arith.constant 0 : i32
    %c0_i32_0 = arith.constant 0 : i32
    return %arg0, %c0_i32 : i32, i32
  }
}

</mosaic_0001>

<bundles_post_ra>
// kernel: tpu_custom_call.1
= control target key start
LH: loop header
LB: loop body
LE: loop exit
PB: predicated region body
PF: predicated region fallthrough
CT: control target
= control target key end

     0   :  { %vm19_vm0 = vcmask 64512   ;;  %v191_v2 = vmov 0.0   ;;  %s279_s0 = inlined_call_operand.vmem [shape: s32[1,128], index: 0, kind: input, shape index: {}]   ;;  %s280_s1 = inlined_call_operand.vmem [shape: f32[128,8], index: 1, kind: input, shape index: {}]   ;;  %s281_s2 = inlined_call_operand.vmem [shape: f32[8,128], index: 2, kind: input, shape index: {}]   ;;  %s282_s3 = inlined_call_operand.hbm [shape: f32[16,128], index: 3, kind: output, shape index: {}]  }
   0x1   :  { %v53_v0 = vld [vmem:[%s280_s1 + $0x78] sm:$0xff]  ;;  %v52_v1 = vld [vmem:[%s280_s1 + $0x70] sm:$0xff]  ;;  %20 = vst.msk [vmem:[#allocation2] sm:$0xff] %vm19_vm0, %v191_v2  ;;  %v51_v3 = vld [vmem:[%s280_s1 + $0x68] sm:$0xff] }
   0x2   :  { %54 = vmatpush.msra.mxu0 %v53_v0  ;;  %143 = vmatpush.msra.mxu2 %v53_v0  ;;  %21 = vst.msk [vmem:[#allocation2 + $0x8] sm:$0xff] %vm19_vm0, %v191_v2  ;;  %v50_v4 = vld [vmem:[%s280_s1 + $0x60] sm:$0xff]  ;;  %v49_v5 = vld [vmem:[%s280_s1 + $0x58] sm:$0xff] }
   0x4   :  { %55 = vmatpush.msra.mxu0 %v52_v1  ;;  %144 = vmatpush.msra.mxu2 %v52_v1 }
   0x6   :  { %56 = vmatpush.msra.mxu0 %v51_v3  ;;  %145 = vmatpush.msra.mxu2 %v51_v3 }
   0x7   :  { %8 = vsyncpa [#allocation4], 0  ;;  %v48_v6 = vld [vmem:[%s280_s1 + $0x50] sm:$0xff]  ;;  %v47_v7 = vld [vmem:[%s280_s1 + $0x48] sm:$0xff]  ;;  %v26_v11 = vlaneseq  ;;  %v192_v21 = vmov 1.0   ;;  %s125_s22 = sshll.u32 %s282_s3, 4  ;;  %s126_s22 = int_to_ptr.hbm [resolvable:$true] %s125_s22 }
   0x8   :  { %57 = vmatpush.msra.mxu0 %v50_v4  ;;  %146 = vmatpush.msra.mxu2 %v50_v4  ;;  %v46_v8 = vld [vmem:[%s280_s1 + $0x40] sm:$0xff]  ;;  %v45_v9 = vld [vmem:[%s280_s1 + $0x38] sm:$0xff]  ;;  %v44_v10 = vld [vmem:[%s280_s1 + $0x30] sm:$0xff]  ;;  %s194_s23 = smov 128   ;;  %s195_s24 = smov 8  }
   0x9   :  { %v43_v12 = vld [vmem:[%s280_s1 + $0x28] sm:$0xff]  ;;  %v42_v13 = vld [vmem:[%s280_s1 + $0x20] sm:$0xff]  ;;  %v27_v14 = vshrl.u32 %v26_v11, 7  ;;  %v41_v15 = vld [vmem:[%s280_s1 + $0x18] sm:$0xff] }
   0xa   :  { %58 = vmatpush.msra.mxu0 %v49_v5  ;;  %147 = vmatpush.msra.mxu2 %v49_v5  ;;  %v40_v16 = vld [vmem:[%s280_s1 + $0x10] sm:$0xff]  ;;  %v164_v17 = vld [vmem:[%s279_s0] ss:$0 sm:$0xff]  ;;  %v39_v19 = vld [vmem:[%s280_s1 + $0x8] sm:$0xff] }
   0xb   :  { %v28_v18 = vadd.s32 8, %v27_v14  ;;  %v38_v20 = vld [vmem:[%s280_s1] sm:$0xff]  ;;  %vm30_vm1 = vcmp.eq.s32.totalorder %v27_v14, %v164_v17  ;;  %v37_v26 = vld [vmem:[#allocation2 + $0x8] sm:$0xff]  ;;  %s193_s1 = smov [#allocation3]  }
   0xc   :  { %59 = vmatpush.msra.mxu0 %v48_v6  ;;  %148 = vmatpush.msra.mxu2 %v48_v6  ;;  %v87_v22 = vld [vmem:[%s281_s2] sm:$0xff]  ;;  %s123_s2 = sshll.u32 %s193_s1, 4  ;;  %s124_s2 = int_to_ptr.vmem [resolvable:$true] %s123_s2 }
   0xd   :  { %vm31_vm2 = vcmp.eq.s32.totalorder %v28_v18, %v164_v17  ;;  %109 = vmatpush.msra.mxu1 %v87_v22  ;;  %v36_v23 = vld [vmem:[#allocation2] sm:$0xff] }
   0xe   :  { %60 = vmatpush.msra.mxu0 %v47_v7  ;;  %149 = vmatpush.msra.mxu2 %v47_v7 }
  0x10   :  { %61 = vmatpush.msra.mxu0 %v46_v8  ;;  %150 = vmatpush.msra.mxu2 %v46_v8 }
  0x12   :  { %62 = vmatpush.msra.mxu0 %v45_v9  ;;  %151 = vmatpush.msra.mxu2 %v45_v9 }
  0x14   :  { %63 = vmatpush.msra.mxu0 %v44_v10  ;;  %152 = vmatpush.msra.mxu2 %v44_v10 }
  0x16   :  { %64 = vmatpush.msra.mxu0 %v43_v12  ;;  %153 = vmatpush.msra.mxu2 %v43_v12 }
  0x18   :  { %65 = vmatpush.msra.mxu0 %v42_v13  ;;  %154 = vmatpush.msra.mxu2 %v42_v13 }
  0x1a   :  { %66 = vmatpush.msra.mxu0 %v41_v15  ;;  %155 = vmatpush.msra.mxu2 %v41_v15 }
  0x1c   :  { %67 = vmatpush.msra.mxu0 %v40_v16  ;;  %156 = vmatpush.msra.mxu2 %v40_v16 }
  0x1e   :  { %68 = vmatpush.msra.mxu0 %v39_v19  ;;  %157 = vmatpush.msra.mxu2 %v39_v19 }
  0x20   :  { %69 = vmatpush.msra.mxu0 %v38_v20  ;;  %158 = vmatpush.msra.mxu2 %v38_v20 }
  0x21   :  { %139 = vmatmul.msk.f32.vlgmr.msra.gmra.mxu0 %vm30_vm1, %v192_v21  ;;  %140 = vmatmul.msk.f32.vlgmr.msra.gmra.mxu2 %vm31_vm2, %v192_v21 }
  0x9e   :  { %v71_v24 = vpop.f32.mrf.mxu0 }
  0x9f   :  { %v77_v25 = vadd.f32 %v71_v24, %v36_v23 }
  0xa1   :  { %80 = vst.msk [vmem:[#allocation2] sm:$0xff] %vm19_vm0, %v77_v25 }
  0xa4   :  { %v74_v27 = vpop.f32.mrf.mxu2 }
  0xa5   :  { %v78_v28 = vadd.f32 %v74_v27, %v37_v26 }
  0xa7   :  { %81 = vst.msk [vmem:[#allocation2 + $0x8] sm:$0xff] %vm19_vm0, %v78_v28 }
  0xa8   :  { %v85_v29 = vld [vmem:[#allocation2] sm:$0xff] }
  0xa9   :  { %141 = vmatmul.msk.f32.vlgmr.msra.gmra.mxu1 %vm19_vm0, %v85_v29 }
  0xae   :  { %v86_v30 = vld [vmem:[#allocation2 + $0x8] sm:$0xff] }
  0xb1   :  { %142 = vmatmul.msk.f32.gmra.mxu1 %vm19_vm0, %v86_v30 }
 0x126   :  { %v111_v31 = vpop.f32.mrf.mxu1 }
 0x127   :  { %117 = vst [vmem:[#allocation3] sm:$0xff] %v111_v31 }
 0x12e   :  { %v114_v32 = vpop.f32.mrf.mxu1 }
 0x12f   :  { %118 = vst [vmem:[#allocation3 + $0x8] sm:$0xff] %v114_v32 }
 0x130   :  { %131 = dma.vmem_to_hbm [thread:$0]  %s124_s2, 256, %s126_s22, [#allocation4], %s194_s23, %s194_s23, %s195_s24  }
 0x131   :  { %189 = dma.done.wait [#allocation4], 256  }
 0x132   :  { %190 = vsyncadd [#allocation4], 4294967040 }
 0x133   :  { %136 = vsyncpa [#allocation4], 1 }

</bundles_post_ra>
